<compile_context>
chip_gen: v7x
topology: tpu7x:2x2x1
jax: 0.10.0
libtpu: 0.0.40
codegen_flags: <defaults>
</compile_context>

<pallas_src>
import jax
import jax.numpy as jnp
from jax.experimental import pallas as pl
from jax.experimental.pallas import tpu as pltpu

_MIB = 1 << 20


def _round_up(x: int, m: int) -> int:
    return ((x + m - 1) // m) * m


def _largest_divisor_leq(n: int, k: int) -> int:
    k = max(1, min(n, k))
    for d in range(k, 0, -1):
        if n % d == 0:
            return d
    return 1


def _vmem_capacity_bytes() -> int:
    """Physical VMEM of the attached TPU; conservative (v7x) fallback."""
    try:
        info = pltpu.get_tpu_info()
        cap = int(getattr(info, "vmem_capacity_bytes", 0))
        if cap > 0:
            return cap
    except Exception:
        pass
    return 64 * _MIB  # v7x per-TensorCore VMEM (smallest of v5e/v6e/v7x)


def _make_kernel(nb: int):
    """leaky_relu(W @ X + b) on one (nb, C_in, tl) block.

    nb is static: the batch loop unrolls into nb independent 2-D MXU matmuls
    with the long L axis on lanes (lane-dense stores).
    """
    def kernel(x_ref, w_ref, b_ref, o_ref):
        w = w_ref[...]          # (C_out, C_in), resident across the grid
        b = b_ref[...]          # (C_out, 1), broadcast across lanes (L)
        for i in range(nb):
            y = jnp.dot(w, x_ref[i], preferred_element_type=jnp.float32)
            y = y + b
            # LeakyReLU(0.2): 2 VALU ops, no cmp/select.
            o_ref[i] = jnp.maximum(y, 0.2 * y).astype(o_ref.dtype)
    return kernel


def _conv1x1_leaky(x, weight, bias2d):
    """x: (B, C_in, L) -> (B, C_out, L). Pad-free cdiv grid over (B, L)."""
    b_dim, c_in, length = x.shape
    c_out = weight.shape[0]
    itemsize = x.dtype.itemsize

    # ---- generation-aware VMEM budget -------------------------------------
    cap = _vmem_capacity_bytes()
    # ~5/8 of VMEM for the double-buffered x/out blocks; ~7/8 as the scoped
    # limit (headroom for weights/bias + compiler scratch).
    # v7x (64 MiB): budget ~40 MiB, limit ~56 MiB; v5e/v6e (128 MiB): 80 / 100.
    block_budget = min(80 * _MIB, max(8 * _MIB, (cap * 5) // 8))
    vmem_limit = min(100 * _MIB, max(16 * _MIB, (cap * 7) // 8))

    # ---- L tile -------------------------------------------------------------
    col_bytes = 2 * (c_in + c_out) * itemsize   # double-buffered x+out per column per batch row
    tl_budget = max(128, (block_budget // col_bytes) // 128 * 128)
    if length <= 128:
        tl = length                             # block == full dim (always legal)
    else:
        tl = min(tl_budget, _round_up(length, 128))
    grid_l = pl.cdiv(length, tl)

    # Keep >= 2 grid steps when possible so both v7x TensorCores get work.
    if b_dim * grid_l < 2 and length > 128:
        tl = max(128, _round_up(pl.cdiv(length, 2), 128))
        grid_l = pl.cdiv(length, tl)

    # ---- batch rows per grid step (amortize per-step overhead) --------------
    nb = 1
    if b_dim > 1:
        step_bytes = (c_in + c_out) * tl * itemsize
        target = 2 * _MIB                       # enough bytes/step to hide ~0.35us overhead
        nb_cap = min(b_dim, 8, max(1, block_budget // (col_bytes * tl)))
        want = min(nb_cap, max(1, target // max(step_bytes, 1)))
        if grid_l == 1:                         # still keep >= 2 steps for v7x
            want = min(want, max(1, b_dim // 2))
        nb = _largest_divisor_leq(b_dim, want)

    grid = (b_dim // nb, grid_l)

    # ---- specs --------------------------------------------------------------
    x_spec = pl.BlockSpec((nb, c_in, tl), lambda bi, li: (bi, 0, li))
    o_spec = pl.BlockSpec((nb, c_out, tl), lambda bi, li: (bi, 0, li))
    w_bytes = c_out * c_in * itemsize
    if w_bytes >= 2 * _MIB:
        # Large resident weights: constant index_map -> single-buffer so the
        # saved VMEM goes to a larger L tile (matters on v7x's 64 MiB).
        w_spec = pl.BlockSpec((c_out, c_in), lambda bi, li: (0, 0),
                              pipeline_mode=pl.Buffered(1))
        b_spec = pl.BlockSpec((c_out, 1), lambda bi, li: (0, 0),
                              pipeline_mode=pl.Buffered(1))
    else:
        w_spec = pl.BlockSpec((c_out, c_in), lambda bi, li: (0, 0))
        b_spec = pl.BlockSpec((c_out, 1), lambda bi, li: (0, 0))

    cost = pl.CostEstimate(
        flops=2 * b_dim * c_out * c_in * length,
        transcendentals=0,
        bytes_accessed=itemsize * (b_dim * c_in * length + c_out * c_in + c_out
                                   + b_dim * c_out * length),
    )

    return pl.pallas_call(
        _make_kernel(nb),
        out_shape=jax.ShapeDtypeStruct((b_dim, c_out, length), x.dtype),
        grid_spec=pltpu.PrefetchScalarGridSpec(
            num_scalar_prefetch=0,
            grid=grid,
            in_specs=[x_spec, w_spec, b_spec],
            out_specs=o_spec,
        ),
        compiler_params=pltpu.CompilerParams(
            dimension_semantics=("parallel", "parallel"),
            vmem_limit_bytes=int(vmem_limit),
        ),
        cost_estimate=cost,
    )(x, weight, bias2d)


def up_mlp_forward(x_ncl, weight_oc, bias):
    """Forward of upMLP: LeakyReLU(Conv1d(kernel=1)(x), 0.2).

    x_ncl: (N, C_in, L); weight_oc: (C_out, C_in) (PyTorch (C_out, C_in, 1)
    squeezed); bias: (C_out,).  Returns (N, C_out, L).
    """
    n, c_in, length = x_ncl.shape
    c_out = weight_oc.shape[0]
    bias2d = bias.reshape(c_out, 1)
    itemsize = x_ncl.dtype.itemsize

    # Small-L path: fold batch into the lane axis (one cheap transpose of a
    # tiny tensor) so the output slab is as lane-dense as the problem allows.
    fold = (length < 128) and (n > 1) and (x_ncl.size * itemsize <= 8 * _MIB)
    if fold:
        x_run = jnp.transpose(x_ncl, (1, 0, 2)).reshape(1, c_in, n * length)
    else:
        x_run = x_ncl

    out = _conv1x1_leaky(x_run, weight_oc, bias2d)

    if fold:
        out = out.reshape(c_out, n, length).transpose(1, 0, 2)
    return out


def _reference(x, w, b):
    y = jnp.einsum("oc,ncl->nol", w, x) + b[None, :, None]
    return jnp.maximum(y, 0.2 * y)


if __name__ == "__main__":
    # Shapes implied by the module: batch=2, input_size=8, L=16, common_size=32
    batch, input_size, seq_len, common_size = 2, 8, 16, 32

    key = jax.random.PRNGKey(0)
    kx, kw, kb = jax.random.split(key, 3)

    x = jax.random.normal(kx, (batch, input_size, seq_len), dtype=jnp.float32)
    # PyTorch Conv1d weight is (C_out, C_in, 1); stored squeezed as (C_out, C_in).
    weight = jax.random.normal(kw, (common_size, input_size), dtype=jnp.float32) * 0.1
    bias = jax.random.normal(kb, (common_size,), dtype=jnp.float32) * 0.1

    out = jax.block_until_ready(up_mlp_forward(x, weight, bias))
    ref = _reference(x, weight, bias)
    assert out.shape == (batch, common_size, seq_len)
    assert jnp.allclose(out, ref, atol=1e-4), "mismatch vs reference (small-L fold path)"

    # Second small check: ragged L >= 128 exercises the pad-free cdiv grid
    # (masked partial L block) and the nb>1 batched-rows-per-step path.
    x2 = jax.random.normal(kx, (4, input_size, 300), dtype=jnp.float32)
    out2 = jax.block_until_ready(up_mlp_forward(x2, weight, bias))
    ref2 = _reference(x2, weight, bias)
    assert out2.shape == (4, common_size, 300)
    assert jnp.allclose(out2, ref2, atol=1e-4), "mismatch vs reference (ragged-L path)"

    print("KERNEL_OK")
</pallas_src>

<mosaic_0001>
module attributes {stable_mosaic.version = 11 : i64} {
  func.func @kernel(%arg0: i32, %arg1: i32, %arg2: memref<1x8x32xf32, #tpu.memory_space<vmem>>, %arg3: memref<32x8xf32, #tpu.memory_space<vmem>>, %arg4: memref<32x1xf32, #tpu.memory_space<vmem>>, %arg5: memref<1x32x32xf32, #tpu.memory_space<vmem>>) attributes {dimension_semantics = [#tpu.dimension_semantics<parallel>, #tpu.dimension_semantics<parallel>], iteration_bounds = array<i64: 1, 1>, scalar_prefetch = 0 : i64, scratch_operands = 0 : i64, tpu.core_type = #tpu.core_type<tc>, window_params = [{transform_indices = @transform_0, window_bounds = array<i64: 1, 8, 32>}, {pipeline_mode = #tpu.pipeline_mode<synchronous>, transform_indices = @transform_1, window_bounds = array<i64: 32, 8>}, {pipeline_mode = #tpu.pipeline_mode<synchronous>, transform_indices = @transform_2, window_bounds = array<i64: 32, 1>}, {transform_indices = @transform_3, window_bounds = array<i64: 1, 32, 32>}]} {
    %c0 = arith.constant 0 : index
    %c0_0 = arith.constant 0 : index
    %0 = vector.load %arg3[%c0, %c0_0] : memref<32x8xf32, #tpu.memory_space<vmem>>, vector<32x8xf32>
    %c0_1 = arith.constant 0 : index
    %c0_2 = arith.constant 0 : index
    %1 = vector.load %arg4[%c0_1, %c0_2] : memref<32x1xf32, #tpu.memory_space<vmem>>, vector<32x1xf32>
    %c0_3 = arith.constant 0 : index
    %c0_4 = arith.constant 0 : index
    %c0_5 = arith.constant 0 : index
    %2 = vector.load %arg2[%c0_3, %c0_4, %c0_5] : memref<1x8x32xf32, #tpu.memory_space<vmem>>, vector<1x8x32xf32>
    %3 = vector.shape_cast %2 : vector<1x8x32xf32> to vector<8x32xf32>
    %cst = arith.constant dense<0.000000e+00> : vector<32x32xf32>
    %4 = tpu.matmul %0, %3, %cst {dimension_numbers = #tpu.dot_dimension_numbers<[1], [0], [0], [1], [0, 0, 1, 1], [], []>} : vector<32x8xf32>, vector<8x32xf32>, vector<32x32xf32> -> vector<32x32xf32>
    %5 = vector.broadcast %1 : vector<32x1xf32> to vector<32x32xf32>
    %6 = arith.addf %4, %5 : vector<32x32xf32>
    %cst_6 = arith.constant 2.000000e-01 : f32
    %7 = vector.broadcast %cst_6 : f32 to vector<32x32xf32>
    %8 = arith.mulf %7, %6 : vector<32x32xf32>
    %9 = arith.maximumf %6, %8 : vector<32x32xf32>
    %c0_7 = arith.constant 0 : index
    %c0_8 = arith.constant 0 : index
    %c0_9 = arith.constant 0 : index
    %10 = vector.load %arg5[%c0_7, %c0_8, %c0_9] : memref<1x32x32xf32, #tpu.memory_space<vmem>>, vector<1x32x32xf32>
    %11 = vector.shape_cast %10 : vector<1x32x32xf32> to vector<32x32xf32>
    %12 = vector.shape_cast %9 : vector<32x32xf32> to vector<1x32x32xf32>
    tpu.vector_store %arg5[%c0_7, %c0_8, %c0_9], %12 {strides = array<i32>} : memref<1x32x32xf32, #tpu.memory_space<vmem>>, vector<1x32x32xf32>,
    return
  }
  func.func @transform_0(%arg0: i32, %arg1: i32) -> (i32, i32, i32) {
    %c0_i32 = arith.constant 0 : i32
    %c0_i32_0 = arith.constant 0 : i32
    return %arg0, %c0_i32, %arg1 : i32, i32, i32
  }
  func.func @transform_1(%arg0: i32, %arg1: i32) -> (i32, i32) {
    %c0_i32 = arith.constant 0 : i32
    %c0_i32_0 = arith.constant 0 : i32
    %c0_i32_1 = arith.constant 0 : i32
    return %c0_i32, %c0_i32_0 : i32, i32
  }
  func.func @transform_2(%arg0: i32, %arg1: i32) -> (i32, i32) {
    %c0_i32 = arith.constant 0 : i32
    %c0_i32_0 = arith.constant 0 : i32
    %c0_i32_1 = arith.constant 0 : i32
    return %c0_i32, %c0_i32_0 : i32, i32
  }
  func.func @transform_3(%arg0: i32, %arg1: i32) -> (i32, i32, i32) {
    %c0_i32 = arith.constant 0 : i32
    %c0_i32_0 = arith.constant 0 : i32
    return %arg0, %c0_i32, %arg1 : i32, i32, i32
  }
}

</mosaic_0001>

<bundles_post_ra>
// kernel: tpu_custom_call.1
= control target key start
LH: loop header
LB: loop body
LE: loop exit
PB: predicated region body
PF: predicated region fallthrough
CT: control target
= control target key end

     0   :  { %vm44_vm0 = vcmask 64512   ;;  %s283_s0 = inlined_call_operand.vmem [shape: f32[1,8,32], index: 0, kind: input, shape index: {}]   ;;  %s284_s1 = inlined_call_operand.vmem [shape: f32[32,8], index: 1, kind: input, shape index: {}]   ;;  %s285_s2 = inlined_call_operand.vmem [shape: f32[32,1], index: 2, kind: input, shape index: {}]   ;;  %s286_s3 = inlined_call_operand.hbm [shape: f32[1,32,32], index: 3, kind: output, shape index: {}]  }
   0x1   :  { %v23_v0 = vld [vmem:[%s283_s0] sm:$0xff]  ;;  %v17_v2 = vld [vmem:[%s284_s1 + $0x10] sm:$0xff]  ;;  %v16_v3 = vld [vmem:[%s284_s1 + $0x8] sm:$0xff] }
   0x2   :  { %v15_v1 = vld [vmem:[%s284_s1] sm:$0xff]  ;;  %180 = vmatprep.subr.mxu0 %v23_v0  ;;  %188 = vmatprep.subr.mxu1 %v23_v0  ;;  %v18_v4 = vld [vmem:[%s284_s1 + $0x18] sm:$0xff]  ;;  %v21_v5 = vld [vmem:[%s285_s2 + $0x10] sm:$0xff] }
   0x3   :  { %181 = vmatpush3.msra.mxu0 %v23_v0  ;;  %189 = vmatpush3.msra.mxu1 %v23_v0  ;;  %v19_v6 = vld [vmem:[%s285_s2] sm:$0xff] }
   0x4   :  { %182 = vmatprep.mubr.msk.f32.mxu0 %vm44_vm0, %v15_v1  ;;  %185 = vmatprep.mubr.msk.f32.mxu1 %vm44_vm0, %v17_v2 }
   0x5   :  { %8 = vsyncpa [#allocation3], 0  ;;  %183 = vmatmul.mubr.msk.f32.vlgmr.msra.gmra.mrb[0].mxu0 %vm44_vm0, %v16_v3  ;;  %186 = vmatmul.mubr.msk.f32.vlgmr.msra.gmra.mrb[0].mxu1 %vm44_vm0, %v18_v4  ;;  %v220_v7 = vmov 0   ;;  %v22_v8 = vld [vmem:[%s285_s2 + $0x18] sm:$0xff]  ;;  %v20_v9 = vld [vmem:[%s285_s2 + $0x8] sm:$0xff]  ;;  %s221_s28 = smov [#allocation2]  }
   0x6   :  { %195 = vset.pattern.permute.xlu1 %v220_v7  ;;  %194 = vset.pattern.permute.xlu0 %v220_v7  ;;  %s160_s29 = sshll.u32 %s221_s28, 4  ;;  %vm150_vm1 = vcmask 261120   ;;  %s161_s29 = int_to_ptr.vmem [resolvable:$true] %s160_s29 }
   0x7   :  { %36 = vperm.xlu1 %195, %v21_v5   ;;  %26 = vperm.xlu0 %194, %v19_v6   ;;  %s196_s2 = scalar_lea.vmem %s161_s29, 512  ;;  %p201_p1 = scmp.lt.s32.totalorder %s161_s29, %s161_s29 }
   0x8   :  { %p197_p0 = scmp.ne.s32.totalorder %s161_s29, %s196_s2  ;;  %p202_p2 = scmp.lt.s32.totalorder %s196_s2, %s196_s2 }
   0xa   :  { %p203_p3 = por %p202_p2, %p201_p1 }
   0xb   :  { %41 = vperm.xlu1 %195, %v22_v8   ;;  %31 = vperm.xlu0 %194, %v20_v9  }
   0xc   :  { %p204_p4 = pnand %p203_p3, %p197_p0 }
  0x86   :  { %v37_v10 = vpop.permute.xlu1 %36  ;;  %v27_v11 = vpop.permute.xlu0 %26 }
  0x8a   :  { %v42_v12 = vpop.permute.xlu1 %41  ;;  %v32_v13 = vpop.permute.xlu0 %31 }
  0xd8   :  { %v184_v14 = vpop.f32.mrb[0].mxu0  ;;  %v187_v15 = vpop.f32.mrb[0].mxu1 }
  0xd9   :  { %v129_v16 = vadd.f32 %v184_v14, %v32_v13  ;;  %v139_v17 = vadd.f32 %v187_v15, %v42_v12  ;;  %v123_v18 = vpop.f32.mrb[1].mxu0  ;;  %v133_v19 = vpop.f32.mrb[1].mxu1 }
  0xda   :  { %v124_v20 = vadd.f32 %v123_v18, %v27_v11  ;;  %v134_v21 = vadd.f32 %v133_v19, %v37_v10 }
  0xdb   :  { %v143_v22 = vmul.f32 0.2, %v129_v16  ;;  %v145_v23 = vmul.f32 0.2, %v139_v17 }
  0xdc   :  { %v142_v24 = vmul.f32 0.2, %v124_v20  ;;  %v144_v25 = vmul.f32 0.2, %v134_v21 }
  0xdd   :  { %v147_v26 = vmax.f32 %v129_v16, %v143_v22  ;;  %v149_v27 = vmax.f32 %v139_v17, %v145_v23 }
  0xde   :  { %v146_v28 = vmax.f32 %v124_v20, %v142_v24  ;;  %v148_v29 = vmax.f32 %v134_v21, %v144_v25 }
  0xdf   :  { %152 = vst.msk [vmem:[#allocation2 + $0x8] sm:$0xff] %vm150_vm1, %v147_v26  ;;  %154 = vst.msk [vmem:[#allocation2 + $0x18] sm:$0xff] %vm150_vm1, %v149_v27 }
  0xe0   :  { %151 = vst.msk [vmem:[#allocation2] sm:$0xff] %vm150_vm1, %v146_v28  ;;  %153 = vst.msk [vmem:[#allocation2 + $0x10] sm:$0xff] %vm150_vm1, %v148_v29 }
  0xe1   :  { %207 = shalt.err (!%p204_p4)
}
  0xe2   :  { %s208_s5 = scalar_lea.hbm %s286_s3, 512 }
  0xe3   :  { %p209_p5 = scmp.ne.s32.totalorder %s286_s3, %s208_s5  ;;  %p212_p6 = scmp.lt.u32.totalorder %s208_s5, %s286_s3 }
  0xe5   :  { %p214_p7 = pnand %p212_p6, %p209_p5 }
  0xe7   :  { %217 = shalt.err (!%p214_p7)
}
  0xe8   :  { %s222_s10 = smov 128   ;;  %s223_s11 = smov 8  }
  0xe9   :  { %166 = dma.vmem_to_hbm [thread:$0]  %s161_s29, 512, %s286_s3, [#allocation3], %s222_s10, %s222_s10, %s223_s11  }
  0xea   :  { %218 = dma.done.wait [#allocation3], 512  }
  0xeb   :  { %219 = vsyncadd [#allocation3], 4294966784 }
  0xec   :  { %170 = vsyncpa [#allocation3], 1 }

</bundles_post_ra>
